<compile_context>
chip_gen: v5e
topology: v5e:2x2
jax: 0.10.0
libtpu: 0.0.40
codegen_flags: <defaults>
</compile_context>

<pallas_src>
import jax
import jax.numpy as jnp
from jax import lax
from jax.experimental import pallas as pl
from jax.experimental.pallas import tpu as pltpu


def _round_up(x, m):
    return ((x + m - 1) // m) * m


def rbfn_kernel(x_ref, c_ref, beta_ref, c2_ref, wx_ref, wr_ref, b_ref, o_ref):
    x = x_ref[...]                               # (TM, n_in)      f32
    cen = c_ref[...]                             # (Cp, n_in)      f32 (zero-padded rows)
    beta = beta_ref[...]                         # (1, Cp)         f32 (zero on padded lanes)
    c2 = c2_ref[...]                             # (1, Cp)         precomputed ||c||^2

    # Pairwise squared distances via ||x||^2 + ||c||^2 - 2 x.c (MXU-friendly).
    x2 = jnp.sum(x * x, axis=1, keepdims=True)   # (TM, 1)
    xc = lax.dot_general(                        # (TM, Cp), contract feature axes
        x, cen,
        dimension_numbers=(((1,), (1,)), ((), ())),
        preferred_element_type=jnp.float32)
    dist2 = jnp.maximum(x2 + c2 - 2.0 * xc, 0.0)   # clamp cancellation noise
    radial = jnp.exp(-beta * dist2)                # (TM, Cp); padded lanes -> 1

    # Linear on concat([x, radial]) == x @ Wx + radial @ Wr + b
    # (padded Wr rows are zero, so the radial padding contributes nothing).
    out = (jnp.dot(x, wx_ref[...], preferred_element_type=jnp.float32)
           + jnp.dot(radial, wr_ref[...], preferred_element_type=jnp.float32)
           + b_ref[...])                           # (TM, n_out_p)

    o_ref[...] = out.astype(o_ref.dtype)


def prepare_rbfn_params(centers, beta, weight, bias):
    """One-time parameter prep (hoisted out of the per-call hot path).

    centers:(C,n_in) beta:(1,C) weight:(n_out, n_in+C) bias:(n_out,)
    """
    num_centers, n_in = centers.shape
    n_out = weight.shape[0]
    n_out_p = _round_up(n_out, 128)          # lane-dense output / weight columns
    c_p = _round_up(num_centers, 128)        # lane-dense radial intermediate

    wx = jnp.transpose(weight[:, :n_in]).astype(jnp.float32)   # (n_in, n_out)
    wr = jnp.transpose(weight[:, n_in:]).astype(jnp.float32)   # (C, n_out)
    wx = jnp.pad(wx, ((0, 0), (0, n_out_p - n_out)))            # (n_in, n_out_p)
    wr = jnp.pad(wr, ((0, c_p - num_centers), (0, n_out_p - n_out)))  # (Cp, n_out_p)
    b = jnp.pad(bias.astype(jnp.float32).reshape(1, n_out),
                ((0, 0), (0, n_out_p - n_out)))                 # (1, n_out_p)

    cf = jnp.pad(centers.astype(jnp.float32),
                 ((0, c_p - num_centers), (0, 0)))              # (Cp, n_in)
    c2 = jnp.sum(cf * cf, axis=1).reshape(1, c_p)               # (1, Cp)
    beta_p = jnp.pad(beta.astype(jnp.float32),
                     ((0, 0), (0, c_p - num_centers)))          # (1, Cp), 0 on pad

    # TODO(synk): when scaling up on v6e/v7x, also cast centers/wx/wr (and x)
    # to bfloat16 here and keep f32 accumulation in the kernel dots.
    return dict(
        centers=cf, beta=beta_p, c2=c2,
        wx=wx, wr=wr, b=b, n_out=n_out,
    )


def rbfn_forward(x, params, *, block_rows=256):
    """x:(N, n_in) -> (N, n_out). `params` from prepare_rbfn_params."""
    n, n_in = x.shape
    centers = params["centers"]
    c_p = centers.shape[0]
    n_out = params["n_out"]
    n_out_p = params["wx"].shape[1]

    # Batch tile: at least 8 (sublane multiple), at most block_rows.
    tm = min(block_rows, _round_up(n, 8))
    tm = _round_up(tm, 8)
    n_pad = _round_up(n, tm)
    x = x.astype(jnp.float32)
    if n_pad != n:
        x = jnp.pad(x, ((0, n_pad - n), (0, 0)))

    grid = (n_pad // tm,)
    out = pl.pallas_call(
        rbfn_kernel,
        out_shape=jax.ShapeDtypeStruct((n_pad, n_out_p), jnp.float32),
        grid_spec=pltpu.PrefetchScalarGridSpec(
            num_scalar_prefetch=0,
            grid=grid,
            in_specs=[
                pl.BlockSpec((tm, n_in), lambda i: (i, 0)),        # x (tiled rows)
                pl.BlockSpec((c_p, n_in), lambda i: (0, 0)),       # centers (resident)
                pl.BlockSpec((1, c_p), lambda i: (0, 0)),          # beta
                pl.BlockSpec((1, c_p), lambda i: (0, 0)),          # ||c||^2
                pl.BlockSpec((n_in, n_out_p), lambda i: (0, 0)),   # Wx
                pl.BlockSpec((c_p, n_out_p), lambda i: (0, 0)),    # Wr
                pl.BlockSpec((1, n_out_p), lambda i: (0, 0)),      # bias
            ],
            out_specs=pl.BlockSpec((tm, n_out_p), lambda i: (i, 0)),
        ),
        compiler_params=pltpu.CompilerParams(
            dimension_semantics=("parallel",)),
    )(x, centers, params["beta"], params["c2"],
      params["wx"], params["wr"], params["b"])

    return out[:n, :n_out]


def rbfn_reference(x, centers, beta, weight, bias):
    """Pure-JAX reference mirroring the PyTorch forward."""
    diff = centers[None, :, :] - x[:, None, :]               # (N, C, n_in)
    dist2 = jnp.sum(diff * diff, axis=2)                     # (N, C)
    radial = jnp.exp(-beta * dist2)                          # (N, C)
    cat = jnp.concatenate([x, radial], axis=1)               # (N, n_in + C)
    return cat @ weight.T + bias


if __name__ == "__main__":
    key = jax.random.PRNGKey(0)
    k_x, k_c, k_w = jax.random.split(key, 3)

    N, n_in, num_centers, n_out = 8, 16, 32, 10

    # Deterministic parameter init matching RBFN.__init__ / initialize_weights():
    #   centers : provided tensor (the module takes them as a constructor arg)
    #   beta    : ones(1, num_centers)
    #   linear W: normal(0, 0.02), bias zero
    x = jax.random.normal(k_x, (N, n_in), dtype=jnp.float32)
    centers = jax.random.normal(k_c, (num_centers, n_in), dtype=jnp.float32)
    beta = jnp.ones((1, num_centers), dtype=jnp.float32)
    weight = 0.02 * jax.random.normal(k_w, (n_out, n_in + num_centers),
                                      dtype=jnp.float32)
    bias = jnp.zeros((n_out,), dtype=jnp.float32)

    # Parameter prep is done ONCE (hoisted out of the per-call path).
    params = prepare_rbfn_params(centers, beta, weight, bias)

    out = rbfn_forward(x, params)
    out = jax.block_until_ready(out)

    ref = rbfn_reference(x, centers, beta, weight, bias)
    assert out.shape == (N, n_out)
    assert jnp.allclose(out, ref, atol=1e-4, rtol=1e-4)

    print("KERNEL_OK")
</pallas_src>

<mosaic_0001>
module attributes {stable_mosaic.version = 11 : i64} {
  func.func @rbfn_kernel(%arg0: i32, %arg1: memref<8x16xf32, #tpu.memory_space<vmem>>, %arg2: memref<128x16xf32, #tpu.memory_space<vmem>>, %arg3: memref<1x128xf32, #tpu.memory_space<vmem>>, %arg4: memref<1x128xf32, #tpu.memory_space<vmem>>, %arg5: memref<16x128xf32, #tpu.memory_space<vmem>>, %arg6: memref<128x128xf32, #tpu.memory_space<vmem>>, %arg7: memref<1x128xf32, #tpu.memory_space<vmem>>, %arg8: memref<8x128xf32, #tpu.memory_space<vmem>>) attributes {dimension_semantics = [#tpu.dimension_semantics<parallel>], iteration_bounds = array<i64: 1>, scalar_prefetch = 0 : i64, scratch_operands = 0 : i64, tpu.core_type = #tpu.core_type<tc>, window_params = [{transform_indices = @transform_0, window_bounds = array<i64: 8, 16>}, {pipeline_mode = #tpu.pipeline_mode<synchronous>, transform_indices = @transform_1, window_bounds = array<i64: 128, 16>}, {pipeline_mode = #tpu.pipeline_mode<synchronous>, transform_indices = @transform_2, window_bounds = array<i64: 1, 128>}, {pipeline_mode = #tpu.pipeline_mode<synchronous>, transform_indices = @transform_3, window_bounds = array<i64: 1, 128>}, {pipeline_mode = #tpu.pipeline_mode<synchronous>, transform_indices = @transform_4, window_bounds = array<i64: 16, 128>}, {pipeline_mode = #tpu.pipeline_mode<synchronous>, transform_indices = @transform_5, window_bounds = array<i64: 128, 128>}, {pipeline_mode = #tpu.pipeline_mode<synchronous>, transform_indices = @transform_6, window_bounds = array<i64: 1, 128>}, {transform_indices = @transform_7, window_bounds = array<i64: 8, 128>}]} {
    %c0 = arith.constant 0 : index
    %c0_0 = arith.constant 0 : index
    %0 = vector.load %arg1[%c0, %c0_0] : memref<8x16xf32, #tpu.memory_space<vmem>>, vector<8x16xf32>
    %c0_1 = arith.constant 0 : index
    %c0_2 = arith.constant 0 : index
    %1 = vector.load %arg2[%c0_1, %c0_2] : memref<128x16xf32, #tpu.memory_space<vmem>>, vector<128x16xf32>
    %c0_3 = arith.constant 0 : index
    %c0_4 = arith.constant 0 : index
    %2 = vector.load %arg3[%c0_3, %c0_4] : memref<1x128xf32, #tpu.memory_space<vmem>>, vector<1x128xf32>
    %c0_5 = arith.constant 0 : index
    %c0_6 = arith.constant 0 : index
    %3 = vector.load %arg4[%c0_5, %c0_6] : memref<1x128xf32, #tpu.memory_space<vmem>>, vector<1x128xf32>
    %4 = arith.mulf %0, %0 : vector<8x16xf32>
    %cst = arith.constant dense<0.000000e+00> : vector<8xf32>
    %5 = vector.multi_reduction <add>, %4, %cst [1] : vector<8x16xf32> to vector<8xf32>
    %6 = vector.shape_cast %5 : vector<8xf32> to vector<8x1xf32>
    %cst_7 = arith.constant dense<0.000000e+00> : vector<8x128xf32>
    %7 = tpu.matmul %0, %1, %cst_7 {dimension_numbers = #tpu.dot_dimension_numbers<[1], [1], [0], [0], [0, 0, 1, 0], [], []>} : vector<8x16xf32>, vector<128x16xf32>, vector<8x128xf32> -> vector<8x128xf32>
    %8 = vector.broadcast %6 : vector<8x1xf32> to vector<8x128xf32>
    %9 = vector.broadcast %3 : vector<1x128xf32> to vector<8x128xf32>
    %10 = arith.addf %8, %9 : vector<8x128xf32>
    %cst_8 = arith.constant 2.000000e+00 : f32
    %11 = vector.broadcast %cst_8 : f32 to vector<8x128xf32>
    %12 = arith.mulf %11, %7 : vector<8x128xf32>
    %13 = arith.subf %10, %12 : vector<8x128xf32>
    %cst_9 = arith.constant 0.000000e+00 : f32
    %14 = vector.broadcast %cst_9 : f32 to vector<8x128xf32>
    %15 = arith.maximumf %13, %14 : vector<8x128xf32>
    %cst_10 = arith.constant 0.000000e+00 : f32
    %16 = vector.broadcast %cst_10 : f32 to vector<1x128xf32>
    %17 = arith.subf %16, %2 : vector<1x128xf32>
    %18 = vector.broadcast %17 : vector<1x128xf32> to vector<8x128xf32>
    %19 = arith.mulf %18, %15 : vector<8x128xf32>
    %20 = math.exp %19 : vector<8x128xf32>
    %c0_11 = arith.constant 0 : index
    %c0_12 = arith.constant 0 : index
    %21 = vector.load %arg5[%c0_11, %c0_12] : memref<16x128xf32, #tpu.memory_space<vmem>>, vector<16x128xf32>
    %cst_13 = arith.constant dense<0.000000e+00> : vector<8x128xf32>
    %22 = tpu.matmul %0, %21, %cst_13 {dimension_numbers = #tpu.dot_dimension_numbers<[1], [0], [0], [1], [0, 0, 1, 1], [], []>} : vector<8x16xf32>, vector<16x128xf32>, vector<8x128xf32> -> vector<8x128xf32>
    %c0_14 = arith.constant 0 : index
    %c0_15 = arith.constant 0 : index
    %23 = vector.load %arg6[%c0_14, %c0_15] : memref<128x128xf32, #tpu.memory_space<vmem>>, vector<128x128xf32>
    %cst_16 = arith.constant dense<0.000000e+00> : vector<8x128xf32>
    %24 = tpu.matmul %20, %23, %cst_16 {dimension_numbers = #tpu.dot_dimension_numbers<[1], [0], [0], [1], [0, 0, 1, 1], [], []>} : vector<8x128xf32>, vector<128x128xf32>, vector<8x128xf32> -> vector<8x128xf32>
    %25 = arith.addf %22, %24 : vector<8x128xf32>
    %c0_17 = arith.constant 0 : index
    %c0_18 = arith.constant 0 : index
    %26 = vector.load %arg7[%c0_17, %c0_18] : memref<1x128xf32, #tpu.memory_space<vmem>>, vector<1x128xf32>
    %27 = vector.broadcast %26 : vector<1x128xf32> to vector<8x128xf32>
    %28 = arith.addf %25, %27 : vector<8x128xf32>
    %c0_19 = arith.constant 0 : index
    %c0_20 = arith.constant 0 : index
    %29 = vector.load %arg8[%c0_19, %c0_20] : memref<8x128xf32, #tpu.memory_space<vmem>>, vector<8x128xf32>
    tpu.vector_store %arg8[%c0_19, %c0_20], %28 {strides = array<i32>} : memref<8x128xf32, #tpu.memory_space<vmem>>, vector<8x128xf32>,
    return
  }
  func.func @transform_0(%arg0: i32) -> (i32, i32) {
    %c0_i32 = arith.constant 0 : i32
    %c0_i32_0 = arith.constant 0 : i32
    return %arg0, %c0_i32 : i32, i32
  }
  func.func @transform_1(%arg0: i32) -> (i32, i32) {
    %c0_i32 = arith.constant 0 : i32
    %c0_i32_0 = arith.constant 0 : i32
    %c0_i32_1 = arith.constant 0 : i32
    return %c0_i32, %c0_i32_0 : i32, i32
  }
  func.func @transform_2(%arg0: i32) -> (i32, i32) {
    %c0_i32 = arith.constant 0 : i32
    %c0_i32_0 = arith.constant 0 : i32
    %c0_i32_1 = arith.constant 0 : i32
    return %c0_i32, %c0_i32_0 : i32, i32
  }
  func.func @transform_3(%arg0: i32) -> (i32, i32) {
    %c0_i32 = arith.constant 0 : i32
    %c0_i32_0 = arith.constant 0 : i32
    %c0_i32_1 = arith.constant 0 : i32
    return %c0_i32, %c0_i32_0 : i32, i32
  }
  func.func @transform_4(%arg0: i32) -> (i32, i32) {
    %c0_i32 = arith.constant 0 : i32
    %c0_i32_0 = arith.constant 0 : i32
    %c0_i32_1 = arith.constant 0 : i32
    return %c0_i32, %c0_i32_0 : i32, i32
  }
  func.func @transform_5(%arg0: i32) -> (i32, i32) {
    %c0_i32 = arith.constant 0 : i32
    %c0_i32_0 = arith.constant 0 : i32
    %c0_i32_1 = arith.constant 0 : i32
    return %c0_i32, %c0_i32_0 : i32, i32
  }
  func.func @transform_6(%arg0: i32) -> (i32, i32) {
    %c0_i32 = arith.constant 0 : i32
    %c0_i32_0 = arith.constant 0 : i32
    %c0_i32_1 = arith.constant 0 : i32
    return %c0_i32, %c0_i32_0 : i32, i32
  }
  func.func @transform_7(%arg0: i32) -> (i32, i32) {
    %c0_i32 = arith.constant 0 : i32
    %c0_i32_0 = arith.constant 0 : i32
    return %arg0, %c0_i32 : i32, i32
  }
}

</mosaic_0001>

<bundles_post_ra>
// kernel: tpu_custom_call.1
= control target key start
LH: loop header
LB: loop body
LE: loop exit
PB: predicated region body
PF: predicated region fallthrough
CT: control target
= control target key end

     0   :  { %12 = vsyncpa [#allocation3], 0  ;;  %s485_s0 = inlined_call_operand.hbm [shape: f32[8,16], index: 0, kind: input, shape index: {}]   ;;  %s486_s1 = inlined_call_operand.vmem [shape: f32[128,16], index: 1, kind: input, shape index: {}]   ;;  %s487_s2 = inlined_call_operand.vmem [shape: f32[1,128], index: 2, kind: input, shape index: {}]   ;;  %s488_s3 = inlined_call_operand.vmem [shape: f32[1,128], index: 3, kind: input, shape index: {}]   ;;  %s489_s4 = inlined_call_operand.vmem [shape: f32[16,128], index: 4, kind: input, shape index: {}]   ;;  %s490_s5 = inlined_call_operand.vmem [shape: f32[128,128], index: 5, kind: input, shape index: {}]   ;;  %s491_s6 = inlined_call_operand.vmem [shape: f32[1,128], index: 6, kind: input, shape index: {}]   ;;  %s492_s7 = inlined_call_operand.hbm [shape: f32[8,128], index: 7, kind: output, shape index: {}]  }
   0x1   :  { %13 = vsyncpa [#allocation4], 0  ;;  %s19_s26 = sshll.u32 %s485_s0, 4  ;;  %s307_s27 = smov [#allocation2]   ;;  %s20_s26 = int_to_ptr.hbm [resolvable:$true] %s19_s26 }
   0x2   :  { %s21_s28 = sshll.u32 %s307_s27, 4  ;;  %s22_s28 = int_to_ptr.vmem [resolvable:$true] %s21_s28 }
   0x3   :  { %24 = dma.hbm_to_vmem [thread:$0]  %s20_s26, 128, %s22_s28, [#allocation3]  }
   0x4   :  { %303 = dma.done.wait [#allocation3], 128  }
   0x5   :  { %304 = vsyncadd [#allocation3], 4294967168  ;;  %vm61_vm0 = vcmask 130048   ;;  %v57_v0 = vld [vmem:[%s486_s1 + $0x78] sm:$0xff]  ;;  %v56_v1 = vld [vmem:[%s486_s1 + $0x70] sm:$0xff]  ;;  %s308_s27 = smov [#allocation5]  }
   0x6   :  { %231 = vmatpush.xpose.msk.msra.mxu0 %vm61_vm0, %v57_v0  ;;  %v55_v2 = vld [vmem:[%s486_s1 + $0x68] sm:$0xff]  ;;  %v54_v3 = vld [vmem:[%s486_s1 + $0x60] sm:$0xff]  ;;  %v53_v4 = vld [vmem:[%s486_s1 + $0x58] sm:$0xff]  ;;  %s221_s30 = sshll.u32 %s492_s7, 4  ;;  %s222_s30 = int_to_ptr.hbm [resolvable:$true] %s221_s30 }
   0x7   :  { %v52_v5 = vld [vmem:[%s486_s1 + $0x50] sm:$0xff]  ;;  %v51_v6 = vld [vmem:[%s486_s1 + $0x48] sm:$0xff]  ;;  %v50_v7 = vld [vmem:[%s486_s1 + $0x40] sm:$0xff] }
   0x8   :  { %v49_v8 = vld [vmem:[%s486_s1 + $0x38] sm:$0xff]  ;;  %v41_v9 = vld [vmem:[#allocation2] sm:$0xff]  ;;  %v166_v12 = vld [vmem:[%s490_s5 + $0x70] sm:$0xff] }
   0x9   :  { %v60_v10 = vmul.f32 %v41_v9, %v41_v9  ;;  %v167_v11 = vld [vmem:[%s490_s5 + $0x78] sm:$0xff]  ;;  %v48_v13 = vld [vmem:[%s486_s1 + $0x30] sm:$0xff]  ;;  %v165_v15 = vld [vmem:[%s490_s5 + $0x68] sm:$0xff] }
   0xa   :  { %232 = vmatpush.xpose.msk.msra.mxu0 %vm61_vm0, %v56_v1  ;;  %168 = vmatpush.msra.mxu1 %v167_v11  ;;  %v164_v16 = vld [vmem:[%s490_s5 + $0x60] sm:$0xff]  ;;  %v47_v17 = vld [vmem:[%s486_s1 + $0x28] sm:$0xff]  ;;  %v163_v18 = vld [vmem:[%s490_s5 + $0x58] sm:$0xff] }
   0xb   :  { %v62_v14 = vsel %vm61_vm0, %v60_v10, 0.0  ;;  %v162_v19 = vld [vmem:[%s490_s5 + $0x50] sm:$0xff]  ;;  %v46_v20 = vld [vmem:[%s486_s1 + $0x20] sm:$0xff]  ;;  %v161_v21 = vld [vmem:[%s490_s5 + $0x48] sm:$0xff] }
   0xc   :  { %63 = vadd.xlane.f32.xlu0 %v62_v14  ;;  %169 = vmatpush.msra.mxu1 %v166_v12  ;;  %v45_v22 = vld [vmem:[%s486_s1 + $0x18] sm:$0xff]  ;;  %v44_v23 = vld [vmem:[%s486_s1 + $0x10] sm:$0xff]  ;;  %v43_v24 = vld [vmem:[%s486_s1 + $0x8] sm:$0xff] }
   0xd   :  { %v42_v25 = vld [vmem:[%s486_s1] sm:$0xff]  ;;  %v159_v27 = vld [vmem:[%s490_s5 + $0x38] sm:$0xff]  ;;  %v158_v28 = vld [vmem:[%s490_s5 + $0x30] sm:$0xff] }
   0xe   :  { %233 = vmatpush.xpose.msk.msra.mxu0 %vm61_vm0, %v55_v2  ;;  %170 = vmatpush.msra.mxu1 %v165_v15  ;;  %v160_v26 = vld [vmem:[%s490_s5 + $0x40] sm:$0xff]  ;;  %v157_v29 = vld [vmem:[%s490_s5 + $0x28] sm:$0xff]  ;;  %v155_v32 = vld [vmem:[%s490_s5 + $0x18] sm:$0xff] }
   0xf   :  { %v156_v30 = vld [vmem:[%s490_s5 + $0x20] sm:$0xff]  ;;  %v151_v31 = vld [vmem:[%s489_s4 + $0x8] sm:$0xff]  ;;  %v154_v34 = vld [vmem:[%s490_s5 + $0x10] sm:$0xff] }
  0x10   :  { %171 = vmatpush.msra.mxu1 %v164_v16  ;;  %202 = vmatpush.msra.mxu2 %v151_v31  ;;  %v150_v33 = vld [vmem:[%s489_s4] sm:$0xff]  ;;  %v153_v35 = vld [vmem:[%s490_s5 + $0x8] sm:$0xff] }
  0x11   :  { %v152_v36 = vld [vmem:[%s490_s5] sm:$0xff] }
  0x12   :  { %234 = vmatpush.xpose.msk.msra.mxu0 %vm61_vm0, %v54_v3  ;;  %172 = vmatpush.msra.mxu1 %v163_v18  ;;  %v251_v37 = vld [vmem:[%s488_s3] ss:$0 sm:$0xff] }
  0x13   :  { %203 = vmatpush.msra.mxu2 %v150_v33  ;;  %v58_v39 = vld [vmem:[%s487_s2] sm:$0x1]  ;;  %s219_s2 = sshll.u32 %s308_s27, 4  ;;  %s220_s2 = int_to_ptr.vmem [resolvable:$true] %s219_s2 }
  0x14   :  { %173 = vmatpush.msra.mxu1 %v162_v19  ;;  %248 = vmatmul.msk.f32.vlgmr.msra.gmra.mxu2 %vm61_vm0, %v41_v9  ;;  %v143_v41 = vsub.f32 0.0, %v58_v39  ;;  %v252_v51 = vld [vmem:[%s491_s6] ss:$0 sm:$0xff] }
  0x16   :  { %235 = vmatpush.xpose.msk.msra.mxu0 %vm61_vm0, %v53_v4  ;;  %174 = vmatpush.msra.mxu1 %v161_v21  ;;  %v145_v45 = vperm.slane %v143_v41, 0 }
  0x18   :  { %175 = vmatpush.msra.mxu1 %v160_v26 }
  0x1a   :  { %236 = vmatpush.xpose.msk.msra.mxu0 %vm61_vm0, %v52_v5  ;;  %176 = vmatpush.msra.mxu1 %v159_v27 }
  0x1c   :  { %177 = vmatpush.msra.mxu1 %v158_v28 }
  0x1e   :  { %237 = vmatpush.xpose.msk.msra.mxu0 %vm61_vm0, %v51_v6  ;;  %178 = vmatpush.msra.mxu1 %v157_v29 }
  0x20   :  { %179 = vmatpush.msra.mxu1 %v156_v30 }
  0x22   :  { %238 = vmatpush.xpose.msk.msra.mxu0 %vm61_vm0, %v50_v7  ;;  %180 = vmatpush.msra.mxu1 %v155_v32 }
  0x24   :  { %181 = vmatpush.msra.mxu1 %v154_v34 }
  0x26   :  { %239 = vmatpush.xpose.msk.msra.mxu0 %vm61_vm0, %v49_v8  ;;  %182 = vmatpush.msra.mxu1 %v153_v35 }
  0x28   :  { %183 = vmatpush.msra.mxu1 %v152_v36 }
  0x2a   :  { %240 = vmatpush.xpose.msk.msra.mxu0 %vm61_vm0, %v48_v13 }
  0x2e   :  { %241 = vmatpush.xpose.msk.msra.mxu0 %vm61_vm0, %v47_v17 }
  0x32   :  { %242 = vmatpush.xpose.msk.msra.mxu0 %vm61_vm0, %v46_v20 }
  0x36   :  { %243 = vmatpush.xpose.msk.msra.mxu0 %vm61_vm0, %v45_v22 }
  0x3a   :  { %244 = vmatpush.xpose.msk.msra.mxu0 %vm61_vm0, %v44_v23 }
  0x3e   :  { %245 = vmatpush.xpose.msk.msra.mxu0 %vm61_vm0, %v43_v24 }
  0x42   :  { %246 = vmatpush.xpose.msk.msra.mxu0 %vm61_vm0, %v42_v25 }
  0x45   :  { %247 = vmatmul.msk.f32.vlgmr.msra.gmra.mxu0 %vm61_vm0, %v41_v9 }
  0x7f   :  { %v64_v38 = vpop.xlane.xlu0 %63 }
  0x80   :  { %v139_v40 = vadd.f32 %v251_v37, %v64_v38 }
  0x97   :  { %v205_v50 = vpop.f32.mrf.mxu2 }
  0xc2   :  { %v133_v42 = vpop.f32.mrf.mxu0 }
  0xc3   :  { %v140_v43 = vmul.f32 2.0, %v133_v42 }
  0xc5   :  { %v141_v44 = vsub.f32 %v139_v40, %v140_v43 }
  0xc7   :  { %v142_v46 = vmax.f32 %v141_v44, 0.0 }
  0xc9   :  { %v147_v47 = vmul.f32 %v145_v45, %v142_v46 }
  0xcb   :  { %v148_v48 = vmul.f32 1.442695, %v147_v47 }
  0xcd   :  { %253 = vpow2.f32 %v148_v48 }
  0xd3   :  { %v254_v49 = vpop.eup %253 }
  0xd4   :  { %184 = vmatmul.f32.vlgmr.msra.gmra.mxu1 %v254_v49 }
 0x151   :  { %v185_v52 = vpop.f32.mrf.mxu1 }
 0x152   :  { %v206_v53 = vadd.f32 %v205_v50, %v185_v52 }
 0x154   :  { %v212_v54 = vadd.f32 %v252_v51, %v206_v53 }
 0x156   :  { %213 = vst [vmem:[#allocation5] sm:$0xff] %v212_v54 }
 0x157   :  { %224 = dma.vmem_to_hbm [thread:$0]  %s220_s2, 128, %s222_s30, [#allocation4]  }
 0x158   :  { %305 = dma.done.wait [#allocation4], 128  }
 0x159   :  { %306 = vsyncadd [#allocation4], 4294967168 }
 0x15a   :  { %229 = vsyncpa [#allocation3], 1 }
 0x15b   :  { %230 = vsyncpa [#allocation4], 1 }

</bundles_post_ra>
